<compile_context>
chip_gen: v5e
topology: v5e:2x2
jax: 0.10.0
libtpu: 0.0.40
codegen_flags: <defaults>
</compile_context>

<pallas_src>
import functools

import jax
import jax.numpy as jnp
from jax import lax
from jax.experimental import pallas as pl
from jax.experimental.pallas import tpu as pltpu


def _round_up(x: int, m: int) -> int:
    return (x + m - 1) // m * m


def _softmax_distance_kernel(a_ref, b_ref, o_ref, *, n_valid, m_valid):
    a = a_ref[...]                       # (Np, Dp), native dtype
    b = b_ref[...]                       # (Mp, Dp), native dtype

    # MXU matmul contracting the last dim of both operands (no transpose of b),
    # accumulating in f32.
    mul = lax.dot_general(
        a, b,
        dimension_numbers=(((1,), (1,)), ((), ())),
        preferred_element_type=jnp.float32,
    )                                    # (Np, Mp) f32

    Np, Mp = mul.shape
    if n_valid < Np or m_valid < Mp:
        # Mask padded rows/columns to -inf so exp() contributes exactly 0 to
        # both the column and row sums. (NaNs can only appear in padded
        # entries, which are sliced off by the wrapper.)
        rows = lax.broadcasted_iota(jnp.int32, (Np, Mp), 0)
        cols = lax.broadcasted_iota(jnp.int32, (Np, Mp), 1)
        valid = (rows < n_valid) & (cols < m_valid)
        mul = jnp.where(valid, mul, -jnp.inf)

    # Single shared shift (softmax is shift invariant per axis) -> one exp pass
    # reused for both the column-wise and row-wise softmax.
    gmax = jnp.max(mul, axis=(0, 1), keepdims=True)      # (1, 1)
    e = jnp.exp(mul - gmax)                               # padded -> exp(-inf)=0

    inv_col = pl.reciprocal(jnp.sum(e, axis=0, keepdims=True), approx=True)  # (1, Mp)
    inv_row = pl.reciprocal(jnp.sum(e, axis=1, keepdims=True), approx=True)  # (Np, 1)

    a2b = e * inv_col                    # softmax over dim 0 (per column)
    b2a = e * inv_row                    # softmax over dim 1 (per row)

    o_ref[...] = (1.0 - (a2b + b2a) * 0.5).astype(o_ref.dtype)


def softmax_distance(a: jax.Array, b: jax.Array) -> jax.Array:
    """Pallas equivalent of unitrack softmax_distance(a, b) -> (N, M)."""
    N, D = a.shape
    M, Db = b.shape
    assert D == Db, "feature dims must match"

    out_dtype = jnp.promote_types(a.dtype, b.dtype)

    # Pad to hardware-friendly shapes: sublane mult-of-8 for N, lane mult-of-128
    # for M (output lane axis) and D (contraction / input lane axis).
    Np = _round_up(max(N, 8), 8)
    Mp = _round_up(max(M, 128), 128)
    Dp = _round_up(max(D, 128), 128)

    a_p = a if (Np == N and Dp == D) else jnp.pad(a, ((0, Np - N), (0, Dp - D)))
    b_p = b if (Mp == M and Dp == D) else jnp.pad(b, ((0, Mp - M), (0, Dp - D)))

    # Rough VMEM estimate: double-buffered inputs + output + f32 intermediates.
    in_itemsize = jnp.dtype(a_p.dtype).itemsize
    vmem_bytes = (
        2 * (Np * Dp + Mp * Dp) * in_itemsize
        + 2 * Np * Mp * jnp.dtype(out_dtype).itemsize
        + 4 * Np * Mp * 4
    )
    vmem_limit = min(max(int(vmem_bytes * 1.5), 4 << 20), 100 << 20)
    # TODO(synk): for very large (N, M) that approach the scoped VMEM ceiling
    # (~32 MiB on v7x), switch to an M-tiled grid with an online row-softmax
    # carried in VMEM scratch and a 'parallel' axis for v7x's second TensorCore;
    # tracking-sized cost matrices fit comfortably in a single block.

    kernel = functools.partial(_softmax_distance_kernel, n_valid=N, m_valid=M)

    out_p = pl.pallas_call(
        kernel,
        out_shape=jax.ShapeDtypeStruct((Np, Mp), out_dtype),
        in_specs=[
            pl.BlockSpec((Np, Dp), lambda: (0, 0)),
            pl.BlockSpec((Mp, Dp), lambda: (0, 0)),
        ],
        out_specs=pl.BlockSpec((Np, Mp), lambda: (0, 0)),
        compiler_params=pltpu.CompilerParams(vmem_limit_bytes=vmem_limit),
    )(a_p, b_p)

    return out_p[:N, :M]


class SoftmaxCost:
    """Mirror of the PyTorch `Softmax(FieldCost)` module.

    `field` selects entries from the candidate/detection dicts; `select`
    optionally picks feature columns. The heavy compute (matmul + dual
    softmax) runs in the Pallas kernel above.
    """

    def __init__(self, field: str, select=None):
        self.field = field
        self.select = list(select) if select is not None else []

    def __call__(self, cs: dict, ds: dict) -> jax.Array:
        ts_field = cs[self.field]
        ds_field = ds[self.field]
        if len(self.select) > 0:
            sel = jnp.asarray(self.select, dtype=jnp.int32)
            ts_field = ts_field[:, sel]
            ds_field = ds_field[:, sel]
        return softmax_distance(ts_field, ds_field)


def _reference(a, b):
    mul = a @ b.T
    a2b = jax.nn.softmax(mul, axis=0)
    b2a = jax.nn.softmax(mul, axis=1)
    return 1.0 - (a2b + b2a) / 2.0


if __name__ == "__main__":
    key = jax.random.PRNGKey(0)
    k1, k2 = jax.random.split(key)

    N, M, D = 8, 16, 32  # tracklets, detections, feature dim
    a = jax.random.normal(k1, (N, D), dtype=jnp.float32)
    b = jax.random.normal(k2, (M, D), dtype=jnp.float32)

    cost = SoftmaxCost(field="feat")
    out = cost({"feat": a}, {"feat": b})
    out = jax.block_until_ready(out)

    ref = _reference(a, b)
    assert out.shape == (N, M)
    # approx reciprocal has ~2^-12 relative error; costs are in [0, 1].
    assert jnp.allclose(out, ref, atol=2e-3, rtol=2e-3), "mismatch vs reference"

    print("KERNEL_OK")
</pallas_src>

<mosaic_0001>
module attributes {stable_mosaic.version = 11 : i64} {
  func.func @_softmax_distance_kernel(%arg0: memref<8x128xf32, #tpu.memory_space<vmem>>, %arg1: memref<128x128xf32, #tpu.memory_space<vmem>>, %arg2: memref<8x128xf32, #tpu.memory_space<vmem>>) attributes {dimension_semantics = [], scalar_prefetch = 0 : i64, scratch_operands = 0 : i64, tpu.core_type = #tpu.core_type<tc>} {
    %c0 = arith.constant 0 : index
    %c0_0 = arith.constant 0 : index
    %0 = vector.load %arg0[%c0, %c0_0] : memref<8x128xf32, #tpu.memory_space<vmem>>, vector<8x128xf32>
    %c0_1 = arith.constant 0 : index
    %c0_2 = arith.constant 0 : index
    %1 = vector.load %arg1[%c0_1, %c0_2] : memref<128x128xf32, #tpu.memory_space<vmem>>, vector<128x128xf32>
    %cst = arith.constant dense<0.000000e+00> : vector<8x128xf32>
    %2 = tpu.matmul %0, %1, %cst {dimension_numbers = #tpu.dot_dimension_numbers<[1], [1], [0], [0], [0, 0, 1, 0], [], []>} : vector<8x128xf32>, vector<128x128xf32>, vector<8x128xf32> -> vector<8x128xf32>
    %3 = tpu.iota {dimensions = array<i32: 0>} : vector<8x128xi32>
    %4 = tpu.iota {dimensions = array<i32: 1>} : vector<8x128xi32>
    %c8_i32 = arith.constant 8 : i32
    %5 = vector.broadcast %c8_i32 : i32 to vector<8x128xi32>
    %6 = arith.cmpi slt, %3, %5 : vector<8x128xi32>
    %c16_i32 = arith.constant 16 : i32
    %7 = vector.broadcast %c16_i32 : i32 to vector<8x128xi32>
    %8 = arith.cmpi slt, %4, %7 : vector<8x128xi32>
    %9 = arith.andi %6, %8 : vector<8x128xi1>
    %cst_3 = arith.constant 0xFF800000 : f32
    %10 = vector.broadcast %cst_3 : f32 to vector<8x128xf32>
    %11 = arith.select %9, %2, %10 : vector<8x128xi1>, vector<8x128xf32>
    %12 = vector.shape_cast %11 : vector<8x128xf32> to vector<1x8x128xf32>
    %cst_4 = arith.constant dense<0xFF800000> : vector<1xf32>
    %13 = vector.multi_reduction <maximumf>, %12, %cst_4 [1, 2] : vector<1x8x128xf32> to vector<1xf32>
    %14 = vector.shape_cast %13 : vector<1xf32> to vector<1x1x1xf32>
    %15 = vector.extract %14[0, 0, 0] : f32 from vector<1x1x1xf32>
    %16 = vector.broadcast %15 : f32 to vector<1x1xf32>
    %17 = vector.broadcast %16 : vector<1x1xf32> to vector<8x128xf32>
    %18 = arith.subf %11, %17 : vector<8x128xf32>
    %19 = math.exp %18 : vector<8x128xf32>
    %cst_5 = arith.constant dense<0.000000e+00> : vector<128xf32>
    %20 = vector.multi_reduction <add>, %19, %cst_5 [0] : vector<8x128xf32> to vector<128xf32>
    %21 = vector.shape_cast %20 : vector<128xf32> to vector<1x128xf32>
    %22 = tpu.reciprocal %21 {approx = true} : vector<1x128xf32> -> vector<1x128xf32>
    %cst_6 = arith.constant dense<0.000000e+00> : vector<8xf32>
    %23 = vector.multi_reduction <add>, %19, %cst_6 [1] : vector<8x128xf32> to vector<8xf32>
    %24 = vector.shape_cast %23 : vector<8xf32> to vector<8x1xf32>
    %25 = tpu.reciprocal %24 {approx = true} : vector<8x1xf32> -> vector<8x1xf32>
    %26 = vector.broadcast %22 : vector<1x128xf32> to vector<8x128xf32>
    %27 = arith.mulf %19, %26 : vector<8x128xf32>
    %28 = vector.broadcast %25 : vector<8x1xf32> to vector<8x128xf32>
    %29 = arith.mulf %19, %28 : vector<8x128xf32>
    %30 = arith.addf %27, %29 : vector<8x128xf32>
    %cst_7 = arith.constant 5.000000e-01 : f32
    %31 = vector.broadcast %cst_7 : f32 to vector<8x128xf32>
    %32 = arith.mulf %30, %31 : vector<8x128xf32>
    %cst_8 = arith.constant 1.000000e+00 : f32
    %33 = vector.broadcast %cst_8 : f32 to vector<8x128xf32>
    %34 = arith.subf %33, %32 : vector<8x128xf32>
    %c0_9 = arith.constant 0 : index
    %c0_10 = arith.constant 0 : index
    %35 = vector.load %arg2[%c0_9, %c0_10] : memref<8x128xf32, #tpu.memory_space<vmem>>, vector<8x128xf32>
    tpu.vector_store %arg2[%c0_9, %c0_10], %34 {strides = array<i32>} : memref<8x128xf32, #tpu.memory_space<vmem>>, vector<8x128xf32>,
    return
  }
}

</mosaic_0001>

<bundles_post_ra>
// kernel: tpu_custom_call.1
= control target key start
LH: loop header
LB: loop body
LE: loop exit
PB: predicated region body
PF: predicated region fallthrough
CT: control target
= control target key end

     0   :  { %7 = vsyncpa [#allocation3], 0  ;;  %s254_s0 = inlined_call_operand.hbm [shape: f32[8,128], index: 0, kind: input, shape index: {}]   ;;  %s255_s1 = inlined_call_operand.hbm [shape: f32[128,128], index: 1, kind: input, shape index: {}]   ;;  %s256_s2 = inlined_call_operand.hbm [shape: f32[8,128], index: 2, kind: output, shape index: {}]  }
   0x1   :  { %8 = vsyncpa [#allocation6], 0 }
   0x2   :  { %9 = vsyncpa [#allocation4], 0  ;;  %s15_s11 = sshll.u32 %s254_s0, 4  ;;  %s225_s12 = smov [#allocation2]   ;;  %s16_s11 = int_to_ptr.hbm [resolvable:$true] %s15_s11 }
   0x3   :  { %s17_s13 = sshll.u32 %s225_s12, 4  ;;  %s25_s16 = sshll.u32 %s255_s1, 4  ;;  %s18_s13 = int_to_ptr.vmem [resolvable:$true] %s17_s13  ;;  %s26_s16 = int_to_ptr.hbm [resolvable:$true] %s25_s16 }
   0x4   :  { %20 = dma.hbm_to_vmem [thread:$0]  %s16_s11, 128, %s18_s13, [#allocation3]  }
   0x5   :  { %s226_s17 = smov [#allocation5]   ;;  %s227_s19 = smov 128  }
   0x6   :  { %s27_s18 = sshll.u32 %s226_s17, 4  ;;  %s228_s20 = smov 8   ;;  %s28_s18 = int_to_ptr.vmem [resolvable:$true] %s27_s18 }
   0x7   :  { %33 = dma.hbm_to_vmem [thread:$0]  %s26_s16, 2048, %s28_s18, [#allocation6], %s227_s19, %s227_s19, %s228_s20  }
   0x8   :  { %219 = dma.done.wait [#allocation3], 128  }
   0x9   :  { %220 = vsyncadd [#allocation3], 4294967168 }
   0xa   :  { %221 = dma.done.wait [#allocation6], 2048  }
   0xb   :  { %222 = vsyncadd [#allocation6], 4294965248  ;;  %v58_v0 = vld [vmem:[#allocation5 + $0x78] sm:$0xff]  ;;  %v57_v1 = vld [vmem:[#allocation5 + $0x70] sm:$0xff]  ;;  %v81_v17 = vlaneseq  ;;  %s229_s1 = smov [#allocation7]   ;;  %s123_s24 = sshll.u32 %s256_s2, 4  ;;  %s124_s24 = int_to_ptr.hbm [resolvable:$true] %s123_s24 }
   0xc   :  { %59 = vmatpush.xpose.msra.mxu0 %v58_v0  ;;  %v56_v2 = vld [vmem:[#allocation5 + $0x68] sm:$0xff]  ;;  %v55_v3 = vld [vmem:[#allocation5 + $0x60] sm:$0xff]  ;;  %v54_v4 = vld [vmem:[#allocation5 + $0x58] sm:$0xff]  ;;  %s121_s21 = sshll.u32 %s229_s1, 4  ;;  %s122_s21 = int_to_ptr.vmem [resolvable:$true] %s121_s21 }
   0xd   :  { %v53_v5 = vld [vmem:[#allocation5 + $0x50] sm:$0xff]  ;;  %v52_v6 = vld [vmem:[#allocation5 + $0x48] sm:$0xff]  ;;  %v51_v7 = vld [vmem:[#allocation5 + $0x40] sm:$0xff]  ;;  %v82_v18 = vand.u32 127, %v81_v17 }
   0xe   :  { %v50_v8 = vld [vmem:[#allocation5 + $0x38] sm:$0xff]  ;;  %v49_v9 = vld [vmem:[#allocation5 + $0x30] sm:$0xff]  ;;  %v48_v10 = vld [vmem:[#allocation5 + $0x28] sm:$0xff] }
   0xf   :  { %v47_v11 = vld [vmem:[#allocation5 + $0x20] sm:$0xff]  ;;  %v46_v12 = vld [vmem:[#allocation5 + $0x18] sm:$0xff]  ;;  %v45_v13 = vld [vmem:[#allocation5 + $0x10] sm:$0xff]  ;;  %vm84_vm0 = vcmp.lt.s32.totalorder %v82_v18, 16 }
  0x10   :  { %60 = vmatpush.xpose.msra.mxu0 %v57_v1  ;;  %v44_v14 = vld [vmem:[#allocation5 + $0x8] sm:$0xff]  ;;  %v43_v15 = vld [vmem:[#allocation5] sm:$0xff]  ;;  %v42_v16 = vld [vmem:[#allocation2] sm:$0xff] }
  0x14   :  { %61 = vmatpush.xpose.msra.mxu0 %v56_v2 }
  0x18   :  { %62 = vmatpush.xpose.msra.mxu0 %v55_v3 }
  0x1c   :  { %63 = vmatpush.xpose.msra.mxu0 %v54_v4 }
  0x20   :  { %64 = vmatpush.xpose.msra.mxu0 %v53_v5 }
  0x24   :  { %65 = vmatpush.xpose.msra.mxu0 %v52_v6 }
  0x28   :  { %66 = vmatpush.xpose.msra.mxu0 %v51_v7 }
  0x2c   :  { %67 = vmatpush.xpose.msra.mxu0 %v50_v8 }
  0x30   :  { %68 = vmatpush.xpose.msra.mxu0 %v49_v9 }
  0x34   :  { %69 = vmatpush.xpose.msra.mxu0 %v48_v10 }
  0x38   :  { %70 = vmatpush.xpose.msra.mxu0 %v47_v11 }
  0x3c   :  { %71 = vmatpush.xpose.msra.mxu0 %v46_v12 }
  0x40   :  { %72 = vmatpush.xpose.msra.mxu0 %v45_v13 }
  0x44   :  { %73 = vmatpush.xpose.msra.mxu0 %v44_v14 }
  0x48   :  { %74 = vmatpush.xpose.msra.mxu0 %v43_v15 }
  0x4b   :  { %75 = vmatmul.f32.vlgmr.msra.gmra.mxu0 %v42_v16 }
  0xc8   :  { %v76_v19 = vpop.f32.mrf.mxu0 }
  0xc9   :  { %v86_v20 = vsel %vm84_vm0, %v76_v19, -inf }
  0xca   :  { %87 = vmax.xlane.f32.xlu0 %v86_v20 }
 0x13d   :  { %v88_v21 = vpop.xlane.xlu0 %87 }
 0x13e   :  { %v89_v22 = vrot.slane %v88_v21, 4 }
 0x140   :  { %v90_v23 = vmax.f32 %v88_v21, %v89_v22 }
 0x142   :  { %v91_v24 = vrot.slane %v90_v23, 2 }
 0x144   :  { %v92_v25 = vmax.f32 %v90_v23, %v91_v24 }
 0x146   :  { %v93_v26 = vrot.slane %v92_v25, 1 }
 0x148   :  { %v94_v27 = vmax.f32 %v92_v25, %v93_v26 }
 0x14a   :  { %134 = vpush %v94_v27 }
 0x17b   :  { %s135_s0 = spop %134 }
 0x17c   :  { %v96_v28 = vstv %s135_s0 }
 0x17d   :  { %v97_v29 = vsub.f32 %v86_v20, %v96_v28 }
 0x17f   :  { %v98_v30 = vmul.f32 1.442695, %v97_v29 }
 0x181   :  { %141 = vpow2.f32 %v98_v30 }
 0x187   :  { %v142_v31 = vpop.eup %141 }
 0x188   :  { %107 = vadd.xlane.f32.xlu0 %v142_v31  ;;  %v100_v32 = vrot.slane %v142_v31, 4 }
 0x18a   :  { %v101_v33 = vadd.f32 %v142_v31, %v100_v32 }
 0x18c   :  { %v102_v34 = vrot.slane %v101_v33, 2 }
 0x18e   :  { %v103_v35 = vadd.f32 %v102_v34, %v101_v33 }
 0x190   :  { %v104_v36 = vrot.slane %v103_v35, 1 }
 0x192   :  { %v105_v37 = vadd.f32 %v104_v36, %v103_v35 }
 0x194   :  { %143 = vrcp.f32 %v105_v37 }
 0x19a   :  { %v144_v39 = vpop.eup %143 }
 0x19b   :  { %v110_v42 = vmul.f32 %v144_v39, %v142_v31 }
 0x1fb   :  { %v108_v38 = vpop.xlane.xlu0 %107 }
 0x1fc   :  { %145 = vrcp.f32 %v108_v38 }
 0x202   :  { %v146_v40 = vpop.eup %145 }
 0x203   :  { %v111_v41 = vmul.f32 %v146_v40, %v142_v31 }
 0x205   :  { %v112_v43 = vadd.f32 %v111_v41, %v110_v42 }
 0x207   :  { %v113_v44 = vmul.f32 0.5, %v112_v43 }
 0x209   :  { %v114_v45 = vsub.f32 1.0, %v113_v44 }
 0x20b   :  { %115 = vst [vmem:[#allocation7] sm:$0xff] %v114_v45 }
 0x20c   :  { %126 = dma.vmem_to_hbm [thread:$0]  %s122_s21, 128, %s124_s24, [#allocation4]  }
 0x20d   :  { %223 = dma.done.wait [#allocation4], 128  }
 0x20e   :  { %224 = vsyncadd [#allocation4], 4294967168 }
 0x20f   :  { %131 = vsyncpa [#allocation3], 1 }
 0x210   :  { %132 = vsyncpa [#allocation6], 1 }
 0x211   :  { %133 = vsyncpa [#allocation4], 1 }

</bundles_post_ra>
